<compile_context>
chip_gen: v7x
topology: tpu7x:2x2x1
jax: 0.10.0
libtpu: 0.0.40
codegen_flags: <defaults>
</compile_context>

<pallas_src>
import jax
import jax.numpy as jnp
from jax.experimental import pallas as pl
from jax.experimental.pallas import tpu as pltpu

INPUT_FEATURES = 30
_F_PAD = 32      # pad features 30 -> 32 so 4 samples pack into one 128-lane row
_PACK = 4        # original rows per packed (128-lane) row
_ROW_ALIGN = 64  # pad B to this => packed rows are a multiple of 16 (bf16-safe sublanes)


def _round_up(n, m):
    return ((n + m - 1) // m) * m


def _vmem_capacity_bytes():
    """Trace-time VMEM capacity query; conservative fallback if unavailable."""
    try:
        cap = getattr(pltpu.get_tpu_info(), "vmem_capacity_bytes", None)
        if cap:
            return int(cap)
    except Exception:
        pass
    return 64 * 1024 * 1024


def _tiling(bp):
    """Pick packed-row tile (TBp) and scoped-VMEM limit per generation / batch size."""
    vmem = _vmem_capacity_bytes()
    if vmem >= 100 * 1024 * 1024:
        # v5e / v6e: 128 MiB physical VMEM, one TensorCore -> large tiles amortize the
        # ~0.35 us per-grid-step overhead.
        tbp_max, vmem_limit, min_steps = 16384, 96 * 1024 * 1024, 1
    else:
        # v7x (64 MiB per TC) or unknown: smaller tiles, sized from B so the grid has
        # >= 2 TensorCores x ~4 steps each (megacore sharding + double buffering).
        tbp_max, vmem_limit, min_steps = 2048, 40 * 1024 * 1024, 8
    tbp = min(tbp_max, _round_up(pl.cdiv(bp, min_steps), 16))
    tbp = max(16, min(tbp, bp))  # bp is a multiple of 16 by construction
    return tbp, vmem_limit


def logreg_kernel(x_ref, w_ref, b_ref, o_ref):
    # x_ref: (TBp, 128) VMEM tile -- 4 padded samples per dense 128-lane row.
    # w_ref: (128, 4) block-diagonal weight (resident). b_ref: (1,) f32 SMEM scalar.
    # MXU performs the segmented reduction (no XLU cross-lane work); sigmoid on the EUP.
    y = jnp.dot(x_ref[...], w_ref[...], preferred_element_type=jnp.float32)
    y = y + b_ref[0]
    o_ref[...] = jax.nn.sigmoid(y).astype(o_ref.dtype)


def my_logistic_regression(x, weight, bias):
    """Pallas forward of MyLogisticRegression: sigmoid(x @ W^T + b) -> (B, 1)."""
    B, F = x.shape
    assert weight.shape == (1, F)
    assert F <= _F_PAD

    # ---- wrapper-side repack: (B, F) -> (B_pad, 32) -> (B_pad//4, 128) free view ----
    b_pad = _round_up(max(B, 1), _ROW_ALIGN)
    if b_pad != B or F != _F_PAD:
        x_p = jnp.pad(x, ((0, b_pad - B), (0, _F_PAD - F)))
    else:
        x_p = x
    bp = b_pad // _PACK
    x_packed = x_p.reshape(bp, _PACK * _F_PAD)  # (Bp, 128), contiguous view

    # Block-diagonal (128, 4) weight: column j holds w in rows 32*j .. 32*j+29.
    w_col = jnp.pad(weight.reshape(F), (0, _F_PAD - F))                      # (32,)
    w_blk = jnp.kron(jnp.eye(_PACK, dtype=weight.dtype), w_col[:, None])     # (128, 4)

    bias_f32 = bias.reshape((1,)).astype(jnp.float32)  # keep bias f32 on the scalar path

    tbp, vmem_limit = _tiling(bp)
    grid = (pl.cdiv(bp, tbp),)

    in_itemsize = jnp.dtype(x.dtype).itemsize
    cost = pl.CostEstimate(
        flops=2 * bp * 128 * _PACK,
        transcendentals=b_pad,
        bytes_accessed=bp * 128 * in_itemsize
        + bp * _PACK * in_itemsize
        + 128 * _PACK * in_itemsize
        + 4,
    )

    out_packed = pl.pallas_call(
        logreg_kernel,
        out_shape=jax.ShapeDtypeStruct((bp, _PACK), x.dtype),
        grid=grid,
        in_specs=[
            pl.BlockSpec((tbp, _PACK * _F_PAD), lambda i: (i, 0)),    # dense 128-lane x rows
            pl.BlockSpec((_PACK * _F_PAD, _PACK), lambda i: (0, 0)),  # resident block weight
            pl.BlockSpec(memory_space=pltpu.MemorySpace.SMEM),        # f32 bias scalar
        ],
        out_specs=pl.BlockSpec((tbp, _PACK), lambda i: (i, 0)),
        compiler_params=pltpu.CompilerParams(
            dimension_semantics=("parallel",),  # v7x: both TensorCores split the batch grid
            vmem_limit_bytes=vmem_limit,
        ),
        cost_estimate=cost,
    )(x_packed, w_blk, bias_f32)

    # (Bp, 4) -> (B_pad, 1) -> drop padded rows.
    return out_packed.reshape(b_pad, 1)[:B]


def _reference(x, weight, bias):
    return jax.nn.sigmoid(x @ weight.T + bias[None, :])


if __name__ == "__main__":
    key = jax.random.PRNGKey(0)
    kx, kw, kb = jax.random.split(key, 3)

    batch = 8
    x = jax.random.normal(kx, (batch, INPUT_FEATURES), dtype=jnp.float32)

    # Deterministic parameter init (mimics Linear's uniform(-1/sqrt(F), 1/sqrt(F)))
    bound = 1.0 / jnp.sqrt(jnp.float32(INPUT_FEATURES))
    weight = jax.random.uniform(
        kw, (1, INPUT_FEATURES), minval=-bound, maxval=bound, dtype=jnp.float32
    )
    bias = jax.random.uniform(kb, (1,), minval=-bound, maxval=bound, dtype=jnp.float32)

    out = jax.block_until_ready(my_logistic_regression(x, weight, bias))

    ref = _reference(x, weight, bias)
    assert out.shape == (batch, 1)
    assert jnp.allclose(out, ref, atol=1e-5, rtol=1e-5)

    print("KERNEL_OK")
</pallas_src>

<mosaic_0001>
module attributes {stable_mosaic.version = 11 : i64} {
  func.func @logreg_kernel(%arg0: i32, %arg1: memref<16x128xf32, #tpu.memory_space<vmem>>, %arg2: memref<128x4xf32, #tpu.memory_space<vmem>>, %arg3: memref<1xf32, #tpu.memory_space<smem>>, %arg4: memref<16x4xf32, #tpu.memory_space<vmem>>) attributes {dimension_semantics = [#tpu.dimension_semantics<parallel>], iteration_bounds = array<i64: 1>, scalar_prefetch = 0 : i64, scratch_operands = 0 : i64, tpu.core_type = #tpu.core_type<tc>, window_params = [{transform_indices = @transform_0, window_bounds = array<i64: 16, 128>}, {pipeline_mode = #tpu.pipeline_mode<synchronous>, transform_indices = @transform_1, window_bounds = array<i64: 128, 4>}, {transform_indices = @transform_2, window_bounds = array<i64: 1>}, {transform_indices = @transform_3, window_bounds = array<i64: 16, 4>}]} {
    %c0 = arith.constant 0 : index
    %c0_0 = arith.constant 0 : index
    %0 = vector.load %arg1[%c0, %c0_0] : memref<16x128xf32, #tpu.memory_space<vmem>>, vector<16x128xf32>
    %c0_1 = arith.constant 0 : index
    %c0_2 = arith.constant 0 : index
    %1 = vector.load %arg2[%c0_1, %c0_2] : memref<128x4xf32, #tpu.memory_space<vmem>>, vector<128x4xf32>
    %cst = arith.constant dense<0.000000e+00> : vector<16x4xf32>
    %2 = tpu.matmul %0, %1, %cst {dimension_numbers = #tpu.dot_dimension_numbers<[1], [0], [0], [1], [0, 0, 1, 1], [], []>} : vector<16x128xf32>, vector<128x4xf32>, vector<16x4xf32> -> vector<16x4xf32>
    %c0_3 = arith.constant 0 : index
    %3 = memref.load %arg3[%c0_3] : memref<1xf32, #tpu.memory_space<smem>>
    %4 = vector.broadcast %3 : f32 to vector<16x4xf32>
    %5 = arith.addf %2, %4 : vector<16x4xf32>
    %6 = arith.negf %5 : vector<16x4xf32>
    %7 = math.exp %6 : vector<16x4xf32>
    %cst_4 = arith.constant 1.000000e+00 : f32
    %8 = vector.broadcast %cst_4 : f32 to vector<16x4xf32>
    %9 = arith.addf %8, %7 : vector<16x4xf32>
    %10 = arith.divf %8, %9 : vector<16x4xf32>
    %c0_5 = arith.constant 0 : index
    %c0_6 = arith.constant 0 : index
    %11 = vector.load %arg4[%c0_5, %c0_6] : memref<16x4xf32, #tpu.memory_space<vmem>>, vector<16x4xf32>
    tpu.vector_store %arg4[%c0_5, %c0_6], %10 {strides = array<i32>} : memref<16x4xf32, #tpu.memory_space<vmem>>, vector<16x4xf32>,
    return
  }
  func.func @transform_0(%arg0: i32) -> (i32, i32) {
    %c0_i32 = arith.constant 0 : i32
    %c0_i32_0 = arith.constant 0 : i32
    return %arg0, %c0_i32 : i32, i32
  }
  func.func @transform_1(%arg0: i32) -> (i32, i32) {
    %c0_i32 = arith.constant 0 : i32
    %c0_i32_0 = arith.constant 0 : i32
    %c0_i32_1 = arith.constant 0 : i32
    return %c0_i32, %c0_i32_0 : i32, i32
  }
  func.func @transform_2(%arg0: i32) -> i32 {
    %c0_i32 = arith.constant 0 : i32
    %c0_i32_0 = arith.constant 0 : i32
    return %c0_i32 : i32
  }
  func.func @transform_3(%arg0: i32) -> (i32, i32) {
    %c0_i32 = arith.constant 0 : i32
    %c0_i32_0 = arith.constant 0 : i32
    return %arg0, %c0_i32 : i32, i32
  }
}

</mosaic_0001>

<bundles_post_ra>
// kernel: tpu_custom_call.1
= control target key start
LH: loop header
LB: loop body
LE: loop exit
PB: predicated region body
PF: predicated region fallthrough
CT: control target
= control target key end

     0   :  { %vm122_vm0 = vcmask 31744   ;;  %s307_s1 = inlined_call_operand.vmem [shape: f32[128,4], index: 1, kind: input, shape index: {}]   ;;  %s308_s0 = inlined_call_operand.vmem [shape: f32[16,128], index: 0, kind: input, shape index: {}]   ;;  %s309_s2 = inlined_call_operand.<no memory space> [shape: f32[1], index: 2, kind: input, shape index: {}]   ;;  %s310_s3 = inlined_call_operand.vmem [shape: f32[16,4], index: 3, kind: output, shape index: {}]  }
   0x1   :  { %v17_v0 = vld [vmem:[%s307_s1] sm:$0xff]  ;;  %v18_v1 = vld [vmem:[%s307_s1 + $0x8] sm:$0xff]  ;;  %v19_v2 = vld [vmem:[%s307_s1 + $0x10] sm:$0xff]  ;;  %v34_v26 = vstv %s309_s2 }
   0x2   :  { %v184_v3 = vpack.c.bf16 %v18_v1, %v17_v0  ;;  %v20_v4 = vld [vmem:[%s307_s1 + $0x18] sm:$0xff]  ;;  %v21_v6 = vld [vmem:[%s307_s1 + $0x20] sm:$0xff]  ;;  %v22_v7 = vld [vmem:[%s307_s1 + $0x28] sm:$0xff] }
   0x3   :  { %v188_v5 = vpack.c.bf16 %v20_v4, %v19_v2  ;;  %v192_v8 = vpack.c.bf16 %v22_v7, %v21_v6  ;;  %v15_v9 = vld [vmem:[%s308_s0] sm:$0xff]  ;;  %v23_v10 = vld [vmem:[%s307_s1 + $0x30] sm:$0xff]  ;;  %v24_v11 = vld [vmem:[%s307_s1 + $0x38] sm:$0xff] }
   0x4   :  { %185 = vmatprep.subr.bf16.mxu0 %v184_v3  ;;  %181 = vmatprep.mubr.f32.mxu0 %v15_v9  ;;  %v196_v12 = vpack.c.bf16 %v24_v11, %v23_v10  ;;  %v25_v13 = vld [vmem:[%s307_s1 + $0x40] sm:$0xff]  ;;  %v26_v14 = vld [vmem:[%s307_s1 + $0x48] sm:$0xff]  ;;  %v27_v16 = vld [vmem:[%s307_s1 + $0x50] sm:$0xff] }
   0x5   :  { %187 = vmatpush3.bf16.msra.mxu0 %v184_v3  ;;  %v200_v15 = vpack.c.bf16 %v26_v14, %v25_v13  ;;  %v28_v17 = vld [vmem:[%s307_s1 + $0x58] sm:$0xff]  ;;  %v29_v19 = vld [vmem:[%s307_s1 + $0x60] sm:$0xff]  ;;  %v30_v20 = vld [vmem:[%s307_s1 + $0x68] sm:$0xff] }
   0x6   :  { %189 = vmatprep.subr.bf16.mxu0 %v188_v5  ;;  %v204_v18 = vpack.c.bf16 %v28_v17, %v27_v16  ;;  %v208_v21 = vpack.c.bf16 %v30_v20, %v29_v19  ;;  %v31_v22 = vld [vmem:[%s307_s1 + $0x70] sm:$0xff]  ;;  %v32_v23 = vld [vmem:[%s307_s1 + $0x78] sm:$0xff]  ;;  %v16_v25 = vld [vmem:[%s308_s0 + $0x8] sm:$0xff] }
   0x7   :  { %v212_v24 = vpack.c.bf16 %v32_v23, %v31_v22 }
   0x9   :  { %191 = vmatpush3.bf16.msra.mxu0 %v188_v5 }
   0xa   :  { %193 = vmatprep.subr.bf16.mxu0 %v192_v8 }
   0xd   :  { %195 = vmatpush3.bf16.msra.mxu0 %v192_v8 }
   0xe   :  { %197 = vmatprep.subr.bf16.mxu0 %v196_v12 }
  0x11   :  { %199 = vmatpush3.bf16.msra.mxu0 %v196_v12 }
  0x12   :  { %201 = vmatprep.subr.bf16.mxu0 %v200_v15 }
  0x15   :  { %203 = vmatpush3.bf16.msra.mxu0 %v200_v15 }
  0x16   :  { %205 = vmatprep.subr.bf16.mxu0 %v204_v18 }
  0x19   :  { %207 = vmatpush3.bf16.msra.mxu0 %v204_v18 }
  0x1a   :  { %209 = vmatprep.subr.bf16.mxu0 %v208_v21 }
  0x1d   :  { %211 = vmatpush3.bf16.msra.mxu0 %v208_v21 }
  0x1e   :  { %213 = vmatprep.subr.bf16.mxu0 %v212_v24 }
  0x21   :  { %215 = vmatpush3.bf16.msra.mxu0 %v212_v24 }
  0x24   :  { %182 = vmatmul.mubr.f32.vlgmr.msra.gmra.mrb[0].mxu0 %v16_v25 }
  0xf7   :  { %v183_v27 = vpop.f32.mrb[0].mxu0 }
  0xf8   :  { %v107_v28 = vadd.f32 %v183_v27, %v34_v26  ;;  %v101_v29 = vpop.f32.mrb[1].mxu0 }
  0xf9   :  { %v102_v30 = vadd.f32 %v101_v29, %v34_v26 }
  0xfa   :  { %v130_v31 = vmul.f32 -1.442695, %v107_v28 }
  0xfb   :  { %v129_v32 = vmul.f32 -1.442695, %v102_v30 }
  0xfc   :  { %216 = vpow2.f32 %v130_v31 }
  0xfd   :  { %218 = vpow2.f32 %v129_v32 }
 0x106   :  { %v217_v33 = vpop.eup %216 }
 0x107   :  { %v219_v34 = vpop.eup %218  ;;  %v117_v35 = vadd.f32 1.0, %v217_v33 }
 0x108   :  { %v116_v36 = vadd.f32 1.0, %v219_v34 }
 0x109   :  { %220 = vrcp.f32 %v117_v35 }
 0x10a   :  { %222 = vrcp.f32 %v116_v36 }
 0x113   :  { %v221_v37 = vpop.eup %220 }
 0x114   :  { %v223_v38 = vpop.eup %222  ;;  %124 = vst.msk [vmem:[%s310_s3 + $0x8] sm:$0xff] %vm122_vm0, %v221_v37 }
 0x115   :  { %123 = vst.msk [vmem:[%s310_s3] sm:$0xff] %vm122_vm0, %v223_v38 }

</bundles_post_ra>
